<compile_context>
chip_gen: v7x
topology: tpu7x:2x2x1
jax: 0.10.0
libtpu: 0.0.40
codegen_flags: <defaults>
</compile_context>

<pallas_src>
import functools

import jax
import jax.numpy as jnp
from jax.experimental import pallas as pl
from jax.experimental.pallas import tpu as pltpu

LANE = 128
SUBLANE = 8


def _round_up(x, m):
    return (x + m - 1) // m * m


def _detect_bf16_epilogue():
    """bf16 bias+ReLU epilogue only on generations with a bf16 VPU (v6e/v7x)."""
    try:
        kind = jax.devices()[0].device_kind.lower()
    except Exception:  # pragma: no cover - defensive; default to the safe path
        return False
    return ("v6" in kind) or ("v7" in kind) or ("7x" in kind)


_BF16_EPILOGUE = _detect_bf16_epilogue()


def qnet_kernel(x_ref, w1_ref, b1_ref, w2_ref, b2_ref, w3_ref, b3_ref, out_ref,
                *, bf16_epilogue):
    # Layer 1: (TB, S) @ (S, 128) on the MXU, f32 accumulation. S is the real
    # (unpadded) feature dim; a short-K matmul is cheap and saves input DMA.
    x = x_ref[...].astype(jnp.bfloat16)
    h1 = jnp.dot(x, w1_ref[...], preferred_element_type=jnp.float32)
    if bf16_epilogue:
        h1 = jnp.maximum(h1.astype(jnp.bfloat16) + b1_ref[...].astype(jnp.bfloat16), 0.0)
    else:
        h1 = jnp.maximum(h1 + b1_ref[...], 0.0).astype(jnp.bfloat16)

    # Layer 2: (TB, 128) @ (128, 512)
    h2 = jnp.dot(h1, w2_ref[...], preferred_element_type=jnp.float32)
    if bf16_epilogue:
        h2 = jnp.maximum(h2.astype(jnp.bfloat16) + b2_ref[...].astype(jnp.bfloat16), 0.0)
    else:
        h2 = jnp.maximum(h2 + b2_ref[...], 0.0).astype(jnp.bfloat16)

    # Layer 3: (TB, 512) @ (512, A_pad) -- A_pad is a full 128-lane multiple,
    # so the output store is lane-dense (no masked vst).
    a = jnp.dot(h2, w3_ref[...], preferred_element_type=jnp.float32)
    out_ref[...] = (a + b3_ref[...]).astype(out_ref.dtype)


def prepare_params(params):
    """One-time parameter prep (call OUTSIDE the per-step loop / jit).

    Weights are stored transposed vs. PyTorch ((in, out) so the kernel computes
    x @ W), cast to bf16, and the action dim is zero-padded to a 128-lane
    multiple.  Biases stay f32 (the final epilogue is f32 on every generation).
    """
    w3, b3 = params["w3"], params["b3"]
    A = w3.shape[1]
    A_pad = _round_up(A, LANE)
    if A_pad != A:
        w3 = jnp.pad(w3, ((0, 0), (0, A_pad - A)))
        b3 = jnp.pad(b3, ((0, 0), (0, A_pad - A)))
    return {
        "w1": params["w1"].astype(jnp.bfloat16), "b1": params["b1"],
        "w2": params["w2"].astype(jnp.bfloat16), "b2": params["b2"],
        "w3": w3.astype(jnp.bfloat16),           "b3": b3,
    }


def _choose_tile(B, block_b):
    """Batch tile: as large as block_b, but keep >=2 grid steps when possible
    so v7x's two TensorCores both get work; always a multiple of 8 sublanes."""
    block_b = max(SUBLANE, _round_up(block_b, SUBLANE))
    B_aligned = _round_up(B, SUBLANE)
    tb = min(block_b, B_aligned)
    if B_aligned > SUBLANE:
        half = max(SUBLANE, _round_up(pl.cdiv(B_aligned, 2), SUBLANE))
        tb = min(tb, half)
    return tb


@functools.partial(jax.jit, static_argnames=("num_actions", "block_b"))
def qnetwork_forward(states, prepared, *, num_actions, block_b=1024):
    """states: (B, num_states), f32 or bf16.  prepared: output of prepare_params.

    Returns (B, num_actions) f32 Q-values.  Matches the PyTorch forward up to
    bf16 weight/activation rounding (f32 MXU accumulation throughout).
    """
    w1, b1 = prepared["w1"], prepared["b1"]
    w2, b2 = prepared["w2"], prepared["b2"]
    w3, b3 = prepared["w3"], prepared["b3"]

    B, S = states.shape
    A_pad = w3.shape[1]

    # --- batch tiling (only wrapper-side pass: pad a ragged batch tail) ---
    TB = _choose_tile(B, block_b)
    B_pad = _round_up(B, TB)
    x = states
    if B_pad != B:
        x = jnp.pad(x, ((0, B_pad - B), (0, 0)))
    grid = (B_pad // TB,)

    const2d = lambda i: (0, 0)  # weights/biases stay VMEM-resident across the grid
    kernel = functools.partial(qnet_kernel, bf16_epilogue=_BF16_EPILOGUE)

    out = pl.pallas_call(
        kernel,
        out_shape=jax.ShapeDtypeStruct((B_pad, A_pad), jnp.float32),
        grid=grid,
        in_specs=[
            # x: full-extent feature dim (no zero-pad to 128 -> 4x less input DMA
            # when num_states is small); batch dim tiled.
            pl.BlockSpec((TB, S), lambda i: (i, 0)),
            pl.BlockSpec(w1.shape, const2d), pl.BlockSpec(b1.shape, const2d),
            pl.BlockSpec(w2.shape, const2d), pl.BlockSpec(b2.shape, const2d),
            pl.BlockSpec(w3.shape, const2d), pl.BlockSpec(b3.shape, const2d),
        ],
        out_specs=pl.BlockSpec((TB, A_pad), lambda i: (i, 0)),
        compiler_params=pltpu.CompilerParams(
            dimension_semantics=("parallel",),
        ),
    )(x, w1, b1, w2, b2, w3, b3)

    return out[:B, :num_actions]


def init_params(key, num_states, num_actions):
    """Deterministic init mimicking PyTorch nn.Linear default (uniform +-1/sqrt(fan_in))."""
    def linear(k, fan_in, fan_out):
        kw, kb = jax.random.split(k)
        bound = 1.0 / jnp.sqrt(fan_in)
        w = jax.random.uniform(kw, (fan_in, fan_out), jnp.float32, -bound, bound)
        b = jax.random.uniform(kb, (1, fan_out), jnp.float32, -bound, bound)
        return w, b

    k1, k2, k3 = jax.random.split(key, 3)
    w1, b1 = linear(k1, num_states, 128)
    w2, b2 = linear(k2, 128, 512)
    w3, b3 = linear(k3, 512, num_actions)
    return {"w1": w1, "b1": b1, "w2": w2, "b2": b2, "w3": w3, "b3": b3}


def _reference_matching(states, params):
    """Plain-JAX forward with the exact same bf16/f32 mix as the kernel."""
    w1 = params["w1"].astype(jnp.bfloat16)
    w2 = params["w2"].astype(jnp.bfloat16)
    w3 = params["w3"].astype(jnp.bfloat16)
    h = jnp.dot(states.astype(jnp.bfloat16), w1, preferred_element_type=jnp.float32)
    if _BF16_EPILOGUE:
        h = jnp.maximum(h.astype(jnp.bfloat16) + params["b1"].astype(jnp.bfloat16), 0.0)
    else:
        h = jnp.maximum(h + params["b1"], 0.0).astype(jnp.bfloat16)
    h2 = jnp.dot(h, w2, preferred_element_type=jnp.float32)
    if _BF16_EPILOGUE:
        h2 = jnp.maximum(h2.astype(jnp.bfloat16) + params["b2"].astype(jnp.bfloat16), 0.0)
    else:
        h2 = jnp.maximum(h2 + params["b2"], 0.0).astype(jnp.bfloat16)
    return jnp.dot(h2, w3, preferred_element_type=jnp.float32) + params["b3"]


if __name__ == "__main__":
    num_states, num_actions, batch = 32, 16, 8
    key = jax.random.PRNGKey(0)
    kp, kx = jax.random.split(key)

    params = init_params(kp, num_states, num_actions)
    prepared = prepare_params(params)      # one-time bf16 cast + lane padding
    states = jax.random.normal(kx, (batch, num_states), jnp.float32)

    out = qnetwork_forward(states, prepared, num_actions=num_actions)
    out = jax.block_until_ready(out)
    assert out.shape == (batch, num_actions)

    # Reference 1: identical bf16-weight / f32-accumulate math in plain JAX (tight tol).
    ref_match = _reference_matching(states, params)
    assert jnp.allclose(out, ref_match, atol=1e-3, rtol=1e-3), (
        float(jnp.max(jnp.abs(out - ref_match))))

    # Reference 2: full-f32 PyTorch-equivalent forward (loose tol for bf16 rounding).
    h1f = jnp.maximum(states @ params["w1"] + params["b1"], 0.0)
    h2f = jnp.maximum(h1f @ params["w2"] + params["b2"], 0.0)
    ref_f32 = h2f @ params["w3"] + params["b3"]
    assert jnp.allclose(out, ref_f32, atol=3e-2, rtol=3e-2), (
        float(jnp.max(jnp.abs(out - ref_f32))))

    print("KERNEL_OK")
</pallas_src>

<mosaic_0001>
module attributes {stable_mosaic.version = 11 : i64} {
  func.func @qnet_kernel(%arg0: i32, %arg1: memref<8x32xf32, #tpu.memory_space<vmem>>, %arg2: memref<32x128xbf16, #tpu.memory_space<vmem>>, %arg3: memref<1x128xf32, #tpu.memory_space<vmem>>, %arg4: memref<128x512xbf16, #tpu.memory_space<vmem>>, %arg5: memref<1x512xf32, #tpu.memory_space<vmem>>, %arg6: memref<512x128xbf16, #tpu.memory_space<vmem>>, %arg7: memref<1x128xf32, #tpu.memory_space<vmem>>, %arg8: memref<8x128xf32, #tpu.memory_space<vmem>>) attributes {dimension_semantics = [#tpu.dimension_semantics<parallel>], iteration_bounds = array<i64: 1>, scalar_prefetch = 0 : i64, scratch_operands = 0 : i64, tpu.core_type = #tpu.core_type<tc>, window_params = [{transform_indices = @transform_0, window_bounds = array<i64: 8, 32>}, {pipeline_mode = #tpu.pipeline_mode<synchronous>, transform_indices = @transform_1, window_bounds = array<i64: 32, 128>}, {pipeline_mode = #tpu.pipeline_mode<synchronous>, transform_indices = @transform_2, window_bounds = array<i64: 1, 128>}, {pipeline_mode = #tpu.pipeline_mode<synchronous>, transform_indices = @transform_3, window_bounds = array<i64: 128, 512>}, {pipeline_mode = #tpu.pipeline_mode<synchronous>, transform_indices = @transform_4, window_bounds = array<i64: 1, 512>}, {pipeline_mode = #tpu.pipeline_mode<synchronous>, transform_indices = @transform_5, window_bounds = array<i64: 512, 128>}, {pipeline_mode = #tpu.pipeline_mode<synchronous>, transform_indices = @transform_6, window_bounds = array<i64: 1, 128>}, {transform_indices = @transform_7, window_bounds = array<i64: 8, 128>}]} {
    %c0 = arith.constant 0 : index
    %c0_0 = arith.constant 0 : index
    %0 = vector.load %arg1[%c0, %c0_0] : memref<8x32xf32, #tpu.memory_space<vmem>>, vector<8x32xf32>
    %1 = arith.truncf %0 : vector<8x32xf32> to vector<8x32xbf16>
    %c0_1 = arith.constant 0 : index
    %c0_2 = arith.constant 0 : index
    %2 = vector.load %arg2[%c0_1, %c0_2] : memref<32x128xbf16, #tpu.memory_space<vmem>>, vector<32x128xbf16>
    %cst = arith.constant dense<0.000000e+00> : vector<8x128xf32>
    %3 = tpu.matmul %1, %2, %cst {dimension_numbers = #tpu.dot_dimension_numbers<[1], [0], [0], [1], [0, 0, 1, 1], [], []>} : vector<8x32xbf16>, vector<32x128xbf16>, vector<8x128xf32> -> vector<8x128xf32>
    %c0_3 = arith.constant 0 : index
    %c0_4 = arith.constant 0 : index
    %4 = vector.load %arg3[%c0_3, %c0_4] : memref<1x128xf32, #tpu.memory_space<vmem>>, vector<1x128xf32>
    %5 = vector.broadcast %4 : vector<1x128xf32> to vector<8x128xf32>
    %6 = arith.addf %3, %5 : vector<8x128xf32>
    %cst_5 = arith.constant 0.000000e+00 : f32
    %7 = vector.broadcast %cst_5 : f32 to vector<8x128xf32>
    %8 = arith.maximumf %6, %7 : vector<8x128xf32>
    %9 = arith.truncf %8 : vector<8x128xf32> to vector<8x128xbf16>
    %c0_6 = arith.constant 0 : index
    %c0_7 = arith.constant 0 : index
    %10 = vector.load %arg4[%c0_6, %c0_7] : memref<128x512xbf16, #tpu.memory_space<vmem>>, vector<128x512xbf16>
    %cst_8 = arith.constant dense<0.000000e+00> : vector<8x512xf32>
    %11 = tpu.matmul %9, %10, %cst_8 {dimension_numbers = #tpu.dot_dimension_numbers<[1], [0], [0], [1], [0, 0, 1, 1], [], []>} : vector<8x128xbf16>, vector<128x512xbf16>, vector<8x512xf32> -> vector<8x512xf32>
    %c0_9 = arith.constant 0 : index
    %c0_10 = arith.constant 0 : index
    %12 = vector.load %arg5[%c0_9, %c0_10] : memref<1x512xf32, #tpu.memory_space<vmem>>, vector<1x512xf32>
    %13 = vector.broadcast %12 : vector<1x512xf32> to vector<8x512xf32>
    %14 = arith.addf %11, %13 : vector<8x512xf32>
    %cst_11 = arith.constant 0.000000e+00 : f32
    %15 = vector.broadcast %cst_11 : f32 to vector<8x512xf32>
    %16 = arith.maximumf %14, %15 : vector<8x512xf32>
    %17 = arith.truncf %16 : vector<8x512xf32> to vector<8x512xbf16>
    %c0_12 = arith.constant 0 : index
    %c0_13 = arith.constant 0 : index
    %18 = vector.load %arg6[%c0_12, %c0_13] : memref<512x128xbf16, #tpu.memory_space<vmem>>, vector<512x128xbf16>
    %cst_14 = arith.constant dense<0.000000e+00> : vector<8x128xf32>
    %19 = tpu.matmul %17, %18, %cst_14 {dimension_numbers = #tpu.dot_dimension_numbers<[1], [0], [0], [1], [0, 0, 1, 1], [], []>} : vector<8x512xbf16>, vector<512x128xbf16>, vector<8x128xf32> -> vector<8x128xf32>
    %c0_15 = arith.constant 0 : index
    %c0_16 = arith.constant 0 : index
    %20 = vector.load %arg7[%c0_15, %c0_16] : memref<1x128xf32, #tpu.memory_space<vmem>>, vector<1x128xf32>
    %21 = vector.broadcast %20 : vector<1x128xf32> to vector<8x128xf32>
    %22 = arith.addf %19, %21 : vector<8x128xf32>
    %c0_17 = arith.constant 0 : index
    %c0_18 = arith.constant 0 : index
    %23 = vector.load %arg8[%c0_17, %c0_18] : memref<8x128xf32, #tpu.memory_space<vmem>>, vector<8x128xf32>
    tpu.vector_store %arg8[%c0_17, %c0_18], %22 {strides = array<i32>} : memref<8x128xf32, #tpu.memory_space<vmem>>, vector<8x128xf32>,
    return
  }
  func.func @transform_0(%arg0: i32) -> (i32, i32) {
    %c0_i32 = arith.constant 0 : i32
    %c0_i32_0 = arith.constant 0 : i32
    return %arg0, %c0_i32 : i32, i32
  }
  func.func @transform_1(%arg0: i32) -> (i32, i32) {
    %c0_i32 = arith.constant 0 : i32
    %c0_i32_0 = arith.constant 0 : i32
    %c0_i32_1 = arith.constant 0 : i32
    return %c0_i32, %c0_i32_0 : i32, i32
  }
  func.func @transform_2(%arg0: i32) -> (i32, i32) {
    %c0_i32 = arith.constant 0 : i32
    %c0_i32_0 = arith.constant 0 : i32
    %c0_i32_1 = arith.constant 0 : i32
    return %c0_i32, %c0_i32_0 : i32, i32
  }
  func.func @transform_3(%arg0: i32) -> (i32, i32) {
    %c0_i32 = arith.constant 0 : i32
    %c0_i32_0 = arith.constant 0 : i32
    %c0_i32_1 = arith.constant 0 : i32
    return %c0_i32, %c0_i32_0 : i32, i32
  }
  func.func @transform_4(%arg0: i32) -> (i32, i32) {
    %c0_i32 = arith.constant 0 : i32
    %c0_i32_0 = arith.constant 0 : i32
    %c0_i32_1 = arith.constant 0 : i32
    return %c0_i32, %c0_i32_0 : i32, i32
  }
  func.func @transform_5(%arg0: i32) -> (i32, i32) {
    %c0_i32 = arith.constant 0 : i32
    %c0_i32_0 = arith.constant 0 : i32
    %c0_i32_1 = arith.constant 0 : i32
    return %c0_i32, %c0_i32_0 : i32, i32
  }
  func.func @transform_6(%arg0: i32) -> (i32, i32) {
    %c0_i32 = arith.constant 0 : i32
    %c0_i32_0 = arith.constant 0 : i32
    %c0_i32_1 = arith.constant 0 : i32
    return %c0_i32, %c0_i32_0 : i32, i32
  }
  func.func @transform_7(%arg0: i32) -> (i32, i32) {
    %c0_i32 = arith.constant 0 : i32
    %c0_i32_0 = arith.constant 0 : i32
    return %arg0, %c0_i32 : i32, i32
  }
}

</mosaic_0001>

<bundles_post_ra>
// kernel: qnetwork_forward.1
= control target key start
LH: loop header
LB: loop body
LE: loop exit
PB: predicated region body
PF: predicated region fallthrough
CT: control target
= control target key end

     0   :  { %12 = vsyncpa [#allocation3], 0  ;;  %s1280_s0 = inlined_call_operand.hbm [shape: f32[8,32], index: 0, kind: input, shape index: {}]   ;;  %s1281_s1 = inlined_call_operand.hbm [shape: bf16[32,128], index: 1, kind: input, shape index: {}]   ;;  %s1282_s2 = inlined_call_operand.vmem [shape: f32[1,128], index: 2, kind: input, shape index: {}]   ;;  %s1283_s3 = inlined_call_operand.hbm [shape: bf16[128,512], index: 3, kind: input, shape index: {}]   ;;  %s1284_s4 = inlined_call_operand.vmem [shape: f32[1,512], index: 4, kind: input, shape index: {}]   ;;  %s1285_s5 = inlined_call_operand.hbm [shape: bf16[512,128], index: 5, kind: input, shape index: {}]   ;;  %s1286_s6 = inlined_call_operand.vmem [shape: f32[1,128], index: 6, kind: input, shape index: {}]   ;;  %s1287_s7 = inlined_call_operand.hbm [shape: f32[8,128], index: 7, kind: output, shape index: {}]  }
   0x1   :  { %13 = vsyncpa [#allocation6], 0 }
   0x2   :  { %14 = vsyncpa [#allocation9], 0 }
   0x3   :  { %15 = vsyncpa [#allocation4], 0  ;;  %s1153_s24 = smov [#allocation5]   ;;  %s1035_s28 = scalar_lea.hbm %s1281_s1, 256 }
   0x4   :  { %s31_s25 = sshll.u32 %s1153_s24, 4  ;;  %p1036_p0 = scmp.ne.s32.totalorder %s1281_s1, %s1035_s28  ;;  %s32_s25 = int_to_ptr.vmem [resolvable:$true] %s31_s25 }
   0x5   :  { %p1039_p1 = scmp.lt.u32.totalorder %s1035_s28, %s1281_s1 }
   0x7   :  { %p1041_p2 = pnand %p1039_p1, %p1036_p0 }
   0x9   :  { %1044 = shalt.err (!%p1041_p2)
}
   0xa   :  { %s1045_s10 = scalar_lea.vmem %s32_s25, 256  ;;  %p1050_p4 = scmp.lt.s32.totalorder %s32_s25, %s32_s25 }
   0xb   :  { %p1046_p3 = scmp.ne.s32.totalorder %s32_s25, %s1045_s10  ;;  %p1051_p5 = scmp.lt.s32.totalorder %s1045_s10, %s1045_s10 }
   0xd   :  { %p1052_p6 = por %p1051_p5, %p1050_p4 }
   0xf   :  { %p1053_p7 = pnand %p1052_p6, %p1046_p3 }
  0x11   :  { %1056 = shalt.err (!%p1053_p7)
}
  0x12   :  { %s1154_s11 = smov 64   ;;  %s1155_s12 = smov 4  }
  0x13   :  { %37 = dma.hbm_to_vmem [thread:$0]  %s1281_s1, 256, %s32_s25, [#allocation6], %s1154_s11, %s1154_s11, %s1155_s12  }
  0x14   :  { %s1156_s15 = smov [#allocation2]   ;;  %s1157_s17 = smov [#allocation7]  }
  0x15   :  { %s22_s16 = sshll.u32 %s1156_s15, 4  ;;  %s45_s18 = sshll.u32 %s1157_s17, 4  ;;  %s23_s16 = int_to_ptr.vmem [resolvable:$true] %s22_s16  ;;  %s46_s18 = int_to_ptr.vmem [resolvable:$true] %s45_s18 }
  0x16   :  { %s1057_s21 = scalar_lea.hbm %s1280_s0, 128 }
  0x17   :  { %p1058_p8 = scmp.ne.s32.totalorder %s1280_s0, %s1057_s21  ;;  %p1061_p9 = scmp.lt.u32.totalorder %s1057_s21, %s1280_s0 }
  0x19   :  { %p1063_p10 = pnand %p1061_p9, %p1058_p8 }
  0x1b   :  { %1066 = shalt.err (!%p1063_p10)
}
  0x1c   :  { %s1067_s1 = scalar_lea.vmem %s23_s16, 128  ;;  %p1072_p12 = scmp.lt.s32.totalorder %s23_s16, %s23_s16 }
  0x1d   :  { %p1068_p11 = scmp.ne.s32.totalorder %s23_s16, %s1067_s1  ;;  %p1073_p13 = scmp.lt.s32.totalorder %s1067_s1, %s1067_s1 }
  0x1f   :  { %p1074_p0 = por %p1073_p13, %p1072_p12 }
  0x21   :  { %p1075_p1 = pnand %p1074_p0, %p1068_p11 }
  0x23   :  { %1078 = shalt.err (!%p1075_p1)
}
  0x24   :  { %25 = dma.hbm_to_vmem [thread:$0]  %s1280_s0, 128, %s23_s16, [#allocation3]  }
  0x25   :  { %s1079_s30 = scalar_lea.hbm %s1283_s3, 4096 }
  0x26   :  { %p1080_p2 = scmp.ne.s32.totalorder %s1283_s3, %s1079_s30  ;;  %p1083_p3 = scmp.lt.u32.totalorder %s1079_s30, %s1283_s3 }
  0x28   :  { %p1085_p4 = pnand %p1083_p3, %p1080_p2 }
  0x2a   :  { %1088 = shalt.err (!%p1085_p4)
}
  0x2b   :  { %s1089_s14 = scalar_lea.vmem %s46_s18, 4096  ;;  %p1094_p6 = scmp.lt.s32.totalorder %s46_s18, %s46_s18 }
  0x2c   :  { %p1090_p5 = scmp.ne.s32.totalorder %s46_s18, %s1089_s14  ;;  %p1095_p7 = scmp.lt.s32.totalorder %s1089_s14, %s1089_s14 }
  0x2e   :  { %p1096_p8 = por %p1095_p7, %p1094_p6 }
  0x30   :  { %p1097_p9 = pnand %p1096_p8, %p1090_p5 }
  0x32   :  { %1100 = shalt.err (!%p1097_p9)
}
  0x33   :  { %s1158_s0 = smov 256   ;;  %s1159_s15 = smov 16  }
  0x34   :  { %51 = dma.hbm_to_vmem [thread:$0]  %s1283_s3, 4096, %s46_s18, [#allocation6], %s1158_s0, %s1158_s0, %s1159_s15  }
  0x35   :  { %s1160_s19 = smov [#allocation8]   ;;  %s1101_s23 = scalar_lea.hbm %s1285_s5, 4096 }
  0x36   :  { %s59_s20 = sshll.u32 %s1160_s19, 4  ;;  %p1102_p10 = scmp.ne.s32.totalorder %s1285_s5, %s1101_s23  ;;  %s60_s20 = int_to_ptr.vmem [resolvable:$true] %s59_s20 }
  0x37   :  { %p1105_p11 = scmp.lt.u32.totalorder %s1101_s23, %s1285_s5 }
  0x39   :  { %p1107_p12 = pnand %p1105_p11, %p1102_p10 }
  0x3b   :  { %1110 = shalt.err (!%p1107_p12)
}
  0x3c   :  { %s1111_s27 = scalar_lea.vmem %s60_s20, 4096  ;;  %p1116_p0 = scmp.lt.s32.totalorder %s60_s20, %s60_s20 }
  0x3d   :  { %p1112_p13 = scmp.ne.s32.totalorder %s60_s20, %s1111_s27  ;;  %p1117_p1 = scmp.lt.s32.totalorder %s1111_s27, %s1111_s27 }
  0x3f   :  { %p1118_p2 = por %p1117_p1, %p1116_p0 }
  0x41   :  { %p1119_p3 = pnand %p1118_p2, %p1112_p13 }
  0x43   :  { %1122 = shalt.err (!%p1119_p3)
}
  0x44   :  { %65 = dma.hbm_to_vmem [thread:$0]  %s1285_s5, 4096, %s60_s20, [#allocation9], %s1154_s11, %s1154_s11, %s1155_s12  }
  0x45   :  { %1145 = dma.done.wait [#allocation3], 128  }
  0x46   :  { %1146 = vsyncadd [#allocation3], 4294967168 }
  0x47   :  { %1147 = dma.done.wait [#allocation6], 4352  }
  0x48   :  { %1148 = vsyncadd [#allocation6], 4294962944 }
  0x49   :  { %1149 = dma.done.wait [#allocation9], 4096  }
  0x4a   :  { %1150 = vsyncadd [#allocation9], 4294963200  ;;  %v1161_v0 = vmov 0.0   ;;  %vm1162_vm0 = vmmov 0   ;;  %v953_v1 = vld [vmem:[#allocation5] sm:$0xff]   ;;  %v954_v2 = vld [vmem:[#allocation5 + $0x8] sm:$0xff]  }
  0x4b   :  { %933 = vmatprep.subr.bf16.mxu0 %v1161_v0  ;;  %937 = vmatprep.mubr.msk.bf16.mxu0 %vm1162_vm0, %v1161_v0  ;;  %v81_v3 = vld [vmem:[#allocation2] sm:$0xff]  ;;  %v955_v4 = vld [vmem:[#allocation7 + $0x4] ss:$16 sps:$4 sm:$0xff]   ;;  %v960_v6 = vld [vmem:[#allocation7] ss:$16 sps:$4 sm:$0xff]   ;;  %vm106_vm1 = vcmask 261120  }
  0x4c   :  { %934 = vmatpush3.bf16.msra.mxu0 %v953_v1  ;;  %v959_v5 = vld [vmem:[#allocation7 + $0xc] ss:$16 sps:$4 sm:$0xff]   ;;  %v82_v7 = vpack.c.bf16 %v81_v3, %v81_v3  ;;  %366 = vmatprep.subr.bf16.mxu1 %v955_v4  ;;  %v961_v8 = vld [vmem:[#allocation7 + $0x24] ss:$16 sps:$4 sm:$0xff]   ;;  %v957_v9 = vld [vmem:[#allocation7 + $0x8] ss:$16 sps:$4 sm:$0xff]  }
  0x4d   :  { %935 = vmatprep.subr.bf16.mxu0 %v1161_v0  ;;  %367 = vmatpush1.bf16.msra.mxu1 %v960_v6  ;;  %v965_v10 = vld [vmem:[#allocation7 + $0x2c] ss:$16 sps:$4 sm:$0xff]   ;;  %v966_v11 = vld [vmem:[#allocation7 + $0x20] ss:$16 sps:$4 sm:$0xff]   ;;  %v967_v12 = vld [vmem:[#allocation7 + $0x44] ss:$16 sps:$4 sm:$0xff]  }
  0x4e   :  { %368 = vmatprep.subr.bf16.mxu1 %v961_v8  ;;  %v963_v13 = vld [vmem:[#allocation7 + $0x28] ss:$16 sps:$4 sm:$0xff]   ;;  %v971_v14 = vld [vmem:[#allocation7 + $0x4c] ss:$16 sps:$4 sm:$0xff]   ;;  %v972_v15 = vld [vmem:[#allocation7 + $0x40] ss:$16 sps:$4 sm:$0xff]  }
  0x4f   :  { %v973_v16 = vld [vmem:[#allocation7 + $0x64] ss:$16 sps:$4 sm:$0xff]   ;;  %v969_v17 = vld [vmem:[#allocation7 + $0x48] ss:$16 sps:$4 sm:$0xff]   ;;  %v978_v18 = vld [vmem:[#allocation7 + $0x60] ss:$16 sps:$4 sm:$0xff]  }
  0x50   :  { %936 = vmatpush3.bf16.msra.mxu0 %v954_v2  ;;  %v977_v19 = vld [vmem:[#allocation7 + $0x6c] ss:$16 sps:$4 sm:$0xff]   ;;  %v979_v20 = vld [vmem:[#allocation7 + $0x84] ss:$16 sps:$4 sm:$0xff]   ;;  %v975_v21 = vld [vmem:[#allocation7 + $0x68] ss:$16 sps:$4 sm:$0xff]  }
  0x51   :  { %407 = vmatprep.subr.bf16.mxu0 %v959_v5  ;;  %369 = vmatpush1.bf16.msra.mxu1 %v966_v11  ;;  %v983_v22 = vld [vmem:[#allocation7 + $0x8c] ss:$16 sps:$4 sm:$0xff]   ;;  %v984_v23 = vld [vmem:[#allocation7 + $0x80] ss:$16 sps:$4 sm:$0xff]   ;;  %v985_v24 = vld [vmem:[#allocation7 + $0xa4] ss:$16 sps:$4 sm:$0xff]  }
  0x52   :  { %370 = vmatprep.subr.bf16.mxu1 %v967_v12  ;;  %v981_v25 = vld [vmem:[#allocation7 + $0x88] ss:$16 sps:$4 sm:$0xff]   ;;  %v990_v26 = vld [vmem:[#allocation7 + $0xa0] ss:$16 sps:$4 sm:$0xff]   ;;  %v989_v27 = vld [vmem:[#allocation7 + $0xac] ss:$16 sps:$4 sm:$0xff]  }
  0x53   :  { %938 = vmatmul.mubr.msk.bf16.vlgmr.msra.gmra.mrb[0].mxu0 %vm106_vm1, %v82_v7  ;;  %v991_v28 = vld [vmem:[#allocation7 + $0xc4] ss:$16 sps:$4 sm:$0xff]   ;;  %v987_v29 = vld [vmem:[#allocation7 + $0xa8] ss:$16 sps:$4 sm:$0xff]   ;;  %v995_v30 = vld [vmem:[#allocation7 + $0xcc] ss:$16 sps:$4 sm:$0xff]  }
  0x54   :  { %408 = vmatpush1.bf16.msra.mxu0 %v957_v9  ;;  %v993_v31 = vld [vmem:[#allocation7 + $0xc8] ss:$16 sps:$4 sm:$0xff]   ;;  %v996_v32 = vld [vmem:[#allocation7 + $0xc0] ss:$16 sps:$4 sm:$0xff]   ;;  %v997_v33 = vld [vmem:[#allocation7 + $0xe4] ss:$16 sps:$4 sm:$0xff]  }
  0x55   :  { %409 = vmatprep.subr.bf16.mxu0 %v965_v10  ;;  %371 = vmatpush1.bf16.msra.mxu1 %v972_v15  ;;  %v1001_v34 = vld [vmem:[#allocation7 + $0xec] ss:$16 sps:$4 sm:$0xff]   ;;  %v999_v35 = vld [vmem:[#allocation7 + $0xe8] ss:$16 sps:$4 sm:$0xff]   ;;  %v1002_v36 = vld [vmem:[#allocation7 + $0xe0] ss:$16 sps:$4 sm:$0xff]  }
  0x56   :  { %372 = vmatprep.subr.bf16.mxu1 %v973_v16  ;;  %v1163_v37 = vmov 0   ;;  %v1003_v38 = vld [vmem:[#allocation8 + $0x40] sm:$0xff]   ;;  %v817_v40 = vld [vmem:[%s1282_s2] ss:$0 sm:$0xff]  ;;  %v1011_v54 = vld [vmem:[#allocation8 + $0x50] sm:$0xff]   ;;  %s1164_s29 = smov [#allocation10]  }
  0x57   :  { %398 = vmatprep.mubr.bf16.mxu1 %v1163_v37  ;;  %439 = vmatprep.mubr.bf16.mxu0 %v1163_v37  ;;  %v1004_v39 = vld [vmem:[#allocation8 + $0xc0] sm:$0xff]   ;;  %v1007_v50 = vld [vmem:[#allocation8 + $0x48] sm:$0xff]   ;;  %v1012_v55 = vld [vmem:[#allocation8 + $0xd0] sm:$0xff]   ;;  %s806_s30 = sshll.u32 %s1164_s29, 4  ;;  %s807_s30 = int_to_ptr.vmem [resolvable:$true] %s806_s30 }
  0x58   :  { %410 = vmatpush1.bf16.msra.mxu0 %v963_v13  ;;  %v1005_v47 = vld [vmem:[#allocation8] sm:$0xff]   ;;  %v1008_v51 = vld [vmem:[#allocation8 + $0xc8] sm:$0xff]   ;;  %v1013_v56 = vld [vmem:[#allocation8 + $0x10] sm:$0xff]   ;;  %s1123_s8 = scalar_lea.vmem %s807_s30, 128  ;;  %p1128_p5 = scmp.lt.s32.totalorder %s807_s30, %s807_s30 }
  0x59   :  { %411 = vmatprep.subr.bf16.mxu0 %v971_v14  ;;  %373 = vmatpush1.bf16.msra.mxu1 %v978_v18  ;;  %v1006_v48 = vld [vmem:[#allocation8 + $0x80] sm:$0xff]   ;;  %v1009_v52 = vld [vmem:[#allocation8 + $0x8] sm:$0xff]   ;;  %v1014_v57 = vld [vmem:[#allocation8 + $0x90] sm:$0xff]   ;;  %v186_v14 = vlaneseq  ;;  %p1124_p4 = scmp.ne.s32.totalorder %s807_s30, %s1123_s8  ;;  %p1129_p6 = scmp.lt.s32.totalorder %s1123_s8, %s1123_s8 }
  0x5a   :  { %374 = vmatprep.subr.bf16.mxu1 %v979_v20  ;;  %v1010_v53 = vld [vmem:[#allocation8 + $0x88] sm:$0xff]   ;;  %v1015_v58 = vld [vmem:[#allocation8 + $0x58] sm:$0xff]   ;;  %v1019_v62 = vld [vmem:[#allocation8 + $0x60] sm:$0xff]  }
  0x5b   :  { %v1016_v59 = vld [vmem:[#allocation8 + $0xd8] sm:$0xff]   ;;  %v1020_v63 = vld [vmem:[#allocation8 + $0xe0] sm:$0xff]   ;;  %v1023_v2 = vld [vmem:[#allocation8 + $0x68] sm:$0xff]   ;;  %v187_v15 = vshrl.u32 %v186_v14, 7  ;;  %p1130_p7 = por %p1129_p6, %p1128_p5 }
  0x5c   :  { %412 = vmatpush1.bf16.msra.mxu0 %v969_v17  ;;  %v1017_v60 = vld [vmem:[#allocation8 + $0x18] sm:$0xff]   ;;  %v1021_v0 = vld [vmem:[#allocation8 + $0x20] sm:$0xff]   ;;  %v1024_v3 = vld [vmem:[#allocation8 + $0xe8] sm:$0xff]  }
  0x5d   :  { %413 = vmatprep.subr.bf16.mxu0 %v977_v19  ;;  %375 = vmatpush1.bf16.msra.mxu1 %v984_v23  ;;  %v1018_v61 = vld [vmem:[#allocation8 + $0x98] sm:$0xff]   ;;  %v1022_v1 = vld [vmem:[#allocation8 + $0xa0] sm:$0xff]   ;;  %v1025_v4 = vld [vmem:[#allocation8 + $0x28] sm:$0xff]   ;;  %v188_v16 = vsub.s32 0, %v187_v15  ;;  %v196_v17 = vsub.s32 2, %v187_v15  ;;  %v192_v19 = vsub.s32 1, %v187_v15  ;;  %p1131_p8 = pnand %p1130_p7, %p1124_p4 }
  0x5e   :  { %376 = vmatprep.subr.bf16.mxu1 %v985_v24  ;;  %v1026_v5 = vld [vmem:[#allocation8 + $0xa8] sm:$0xff]   ;;  %v1027_v6 = vld [vmem:[#allocation8 + $0x70] sm:$0xff]   ;;  %v1031_v10 = vld [vmem:[#allocation8 + $0x78] sm:$0xff]   ;;  %v200_v20 = vsub.s32 3, %v187_v15 }
  0x5f   :  { %v1028_v7 = vld [vmem:[#allocation8 + $0xf0] sm:$0xff]   ;;  %v1032_v11 = vld [vmem:[#allocation8 + $0xf8] sm:$0xff]   ;;  %v184_v18 = vld [vmem:[%s1284_s4] sm:$0xf] }
  0x60   :  { %414 = vmatpush1.bf16.msra.mxu0 %v975_v21  ;;  %v1029_v8 = vld [vmem:[#allocation8 + $0x30] sm:$0xff]   ;;  %v1033_v12 = vld [vmem:[#allocation8 + $0x38] sm:$0xff]   ;;  %v189_v21 = vrot.slane %v184_v18, %v188_v16  ;;  %v193_v23 = vrot.slane %v184_v18, %v192_v19  ;;  %v201_v24 = vrot.slane %v184_v18, %v200_v20 }
  0x61   :  { %415 = vmatprep.subr.bf16.mxu0 %v983_v22  ;;  %377 = vmatpush1.bf16.msra.mxu1 %v990_v26  ;;  %v1030_v9 = vld [vmem:[#allocation8 + $0xb0] sm:$0xff]   ;;  %v1034_v13 = vld [vmem:[#allocation8 + $0xb8] sm:$0xff]   ;;  %v197_v22 = vrot.slane %v184_v18, %v196_v17 }
  0x62   :  { %378 = vmatprep.subr.bf16.mxu1 %v991_v28 }
  0x64   :  { %416 = vmatpush1.bf16.msra.mxu0 %v981_v25 }
  0x65   :  { %417 = vmatprep.subr.bf16.mxu0 %v989_v27  ;;  %379 = vmatpush1.bf16.msra.mxu1 %v996_v32 }
  0x66   :  { %380 = vmatprep.subr.bf16.mxu1 %v997_v33 }
  0x68   :  { %418 = vmatpush1.bf16.msra.mxu0 %v987_v29 }
  0x69   :  { %419 = vmatprep.subr.bf16.mxu0 %v995_v30  ;;  %381 = vmatpush1.bf16.msra.mxu1 %v1002_v36 }
  0x6a   :  { %889 = vmatprep.subr.bf16.mxu1 %v1003_v38 }
  0x6c   :  { %420 = vmatpush1.bf16.msra.mxu0 %v993_v31 }
  0x6d   :  { %421 = vmatprep.subr.bf16.mxu0 %v1001_v34 }
  0x70   :  { %422 = vmatpush1.bf16.msra.mxu0 %v999_v35 }
  0x71   :  { %911 = vmatprep.subr.bf16.mxu0 %v1004_v39 }
 0x126   :  { %v144_v41 = vpop.f32.mrb[0].mxu0 }
 0x127   :  { %v145_v42 = vadd.f32 %v817_v40, %v144_v41  ;;  %v939_v43 = vpop.f32.mrb[1].mxu0 }
 0x128   :  { %v147_v44 = vpop.f32.mrb[2].mxu0 }
 0x129   :  { %v150_v45 = vmax.f32 %v145_v42, 0.0  ;;  %v940_v46 = vpop.f32.mrb[3].mxu0 }
 0x12b   :  { %v151_v49 = vpack.c.bf16 %v150_v45, %v150_v45 }
 0x12d   :  { %399 = vmatmul.mubr.bf16.vlgmr.msra.gmra.mrb[0].mxu1 %v151_v49  ;;  %440 = vmatmul.mubr.bf16.vlgmr.msra.gmra.mrb[4].mxu0 %v151_v49 }
 0x12e   :  { %890 = vmatpush3.bf16.msra.mxu1 %v1005_v47  ;;  %912 = vmatpush3.bf16.msra.mxu0 %v1006_v48  ;;  %v853_v47 = vld [vmem:[%s1286_s6] ss:$0 sm:$0xff] }
 0x12f   :  { %891 = vmatprep.subr.bf16.mxu1 %v1007_v50  ;;  %913 = vmatprep.subr.bf16.mxu0 %v1008_v51 }
 0x132   :  { %892 = vmatpush3.bf16.msra.mxu1 %v1009_v52  ;;  %914 = vmatpush3.bf16.msra.mxu0 %v1010_v53 }
 0x133   :  { %893 = vmatprep.subr.bf16.mxu1 %v1011_v54  ;;  %915 = vmatprep.subr.bf16.mxu0 %v1012_v55 }
 0x136   :  { %894 = vmatpush3.bf16.msra.mxu1 %v1013_v56  ;;  %916 = vmatpush3.bf16.msra.mxu0 %v1014_v57 }
 0x137   :  { %895 = vmatprep.subr.bf16.mxu1 %v1015_v58  ;;  %917 = vmatprep.subr.bf16.mxu0 %v1016_v59 }
 0x13a   :  { %896 = vmatpush3.bf16.msra.mxu1 %v1017_v60  ;;  %918 = vmatpush3.bf16.msra.mxu0 %v1018_v61 }
 0x13b   :  { %897 = vmatprep.subr.bf16.mxu1 %v1019_v62  ;;  %919 = vmatprep.subr.bf16.mxu0 %v1020_v63 }
 0x13e   :  { %898 = vmatpush3.bf16.msra.mxu1 %v1021_v0  ;;  %920 = vmatpush3.bf16.msra.mxu0 %v1022_v1 }
 0x13f   :  { %899 = vmatprep.subr.bf16.mxu1 %v1023_v2  ;;  %921 = vmatprep.subr.bf16.mxu0 %v1024_v3 }
 0x142   :  { %900 = vmatpush3.bf16.msra.mxu1 %v1025_v4  ;;  %922 = vmatpush3.bf16.msra.mxu0 %v1026_v5 }
 0x143   :  { %901 = vmatprep.subr.bf16.mxu1 %v1027_v6  ;;  %923 = vmatprep.subr.bf16.mxu0 %v1028_v7 }
 0x146   :  { %902 = vmatpush3.bf16.msra.mxu1 %v1029_v8  ;;  %924 = vmatpush3.bf16.msra.mxu0 %v1030_v9 }
 0x147   :  { %903 = vmatprep.subr.bf16.mxu1 %v1031_v10  ;;  %925 = vmatprep.subr.bf16.mxu0 %v1032_v11 }
 0x14a   :  { %904 = vmatpush3.bf16.msra.mxu1 %v1033_v12  ;;  %926 = vmatpush3.bf16.msra.mxu0 %v1034_v13 }
 0x200   :  { %v400_v25 = vpop.f32.mrb[0].mxu1  ;;  %v441_v26 = vpop.f32.mrb[4].mxu0 }
 0x201   :  { %v401_v27 = vadd.f32 %v400_v25, %v189_v21  ;;  %v442_v28 = vadd.f32 %v441_v26, %v197_v22  ;;  %v402_v29 = vpop.f32.mrb[1].mxu1  ;;  %v443_v30 = vpop.f32.mrb[5].mxu0 }
 0x202   :  { %v403_v31 = vadd.f32 %v402_v29, %v193_v23  ;;  %v444_v32 = vadd.f32 %v443_v30, %v201_v24  ;;  %v404_v33 = vpop.f32.mrb[2].mxu1  ;;  %v445_v34 = vpop.f32.mrb[6].mxu0 }
 0x203   :  { %v448_v35 = vmax.f32 %v401_v27, 0.0  ;;  %v450_v36 = vmax.f32 %v442_v28, 0.0  ;;  %v405_v37 = vpop.f32.mrb[3].mxu1  ;;  %v446_v38 = vpop.f32.mrb[7].mxu0 }
 0x204   :  { %v449_v39 = vmax.f32 %v403_v31, 0.0  ;;  %v451_v40 = vmax.f32 %v444_v32, 0.0 }
 0x205   :  { %v452_v43 = vpack.c.bf16 %v448_v35, %v448_v35  ;;  %v454_v44 = vpack.c.bf16 %v450_v36, %v450_v36 }
 0x206   :  { %v453_v41 = vpack.c.bf16 %v449_v39, %v449_v39  ;;  %v455_v42 = vpack.c.bf16 %v451_v40, %v451_v40 }
 0x208   :  { %751 = vmatprep.mubr.bf16.mxu1 %v453_v41  ;;  %791 = vmatprep.mubr.bf16.mxu0 %v455_v42 }
 0x209   :  { %752 = vmatmul.mubr.bf16.vlgmr.msra.gmra.mrb[4].mxu1 %v452_v43  ;;  %792 = vmatmul.mubr.bf16.vlgmr.msra.gmra.mrb[8].mxu0 %v454_v44 }
 0x2dc   :  { %v905_v45 = vpop.f32.mrb[4].mxu1  ;;  %v927_v46 = vpop.f32.mrb[8].mxu0 }
 0x2dd   :  { %v906_v48 = vpop.f32.mrb[5].mxu1  ;;  %v928_v49 = vpop.f32.mrb[9].mxu0 }
 0x2de   :  { %v907_v50 = vadd.f32 %v906_v48, %v905_v45  ;;  %v929_v51 = vadd.f32 %v928_v49, %v927_v46  ;;  %v908_v52 = vpop.f32.mrb[6].mxu1  ;;  %v930_v53 = vpop.f32.mrb[10].mxu0 }
 0x2df   :  { %v909_v54 = vpop.f32.mrb[7].mxu1  ;;  %v931_v55 = vpop.f32.mrb[11].mxu0 }
 0x2e0   :  { %v754_v56 = vadd.f32 %v907_v50, %v853_v47 }
 0x2e2   :  { %v794_v57 = vadd.f32 %v929_v51, %v754_v56 }
 0x2e4   :  { %799 = vst [vmem:[#allocation10] sm:$0xff] %v794_v57 }
 0x2e5   :  { %1134 = shalt.err (!%p1131_p8)
}
 0x2e6   :  { %s1135_s10 = scalar_lea.hbm %s1287_s7, 128 }
 0x2e7   :  { %p1136_p9 = scmp.ne.s32.totalorder %s1287_s7, %s1135_s10  ;;  %p1139_p10 = scmp.lt.u32.totalorder %s1135_s10, %s1287_s7 }
 0x2e9   :  { %p1141_p11 = pnand %p1139_p10, %p1136_p9 }
 0x2eb   :  { %1144 = shalt.err (!%p1141_p11)
}
 0x2ec   :  { %809 = dma.vmem_to_hbm [thread:$0]  %s807_s30, 128, %s1287_s7, [#allocation4]  }
 0x2ed   :  { %1151 = dma.done.wait [#allocation4], 128  }
 0x2ee   :  { %1152 = vsyncadd [#allocation4], 4294967168 }
 0x2ef   :  { %813 = vsyncpa [#allocation3], 1 }
 0x2f0   :  { %814 = vsyncpa [#allocation6], 1 }
 0x2f1   :  { %815 = vsyncpa [#allocation9], 1 }
 0x2f2   :  { %816 = vsyncpa [#allocation4], 1 }

</bundles_post_ra>
